<compile_context>
chip_gen: v6e
topology: v6e:2x2x1
jax: 0.10.0
libtpu: 0.0.40
codegen_flags: <defaults>
</compile_context>

<pallas_src>
import math

import jax
import jax.numpy as jnp
from jax import lax
from jax.experimental import pallas as pl
from jax.experimental.pallas import tpu as pltpu

_LOG_2PI = math.log(2.0 * math.pi)

_LANES = 512          # lane width for large problems (unmasked vst)
_SMALL_LANES = 128    # lane width for tiny problems
_SUBLANES = 8         # slab height (vreg sublane count)
_MAX_TILE_ROWS = 256


def _round_up(x, m):
    return ((x + m - 1) // m) * m


def _choose_layout(m_elems, num_samples, emit_samples, need_obs,
                   emit_elp, emit_lml):
    """Pick (lanes, tile_rows) under a v7x-safe VMEM budget, keeping >=2 grid steps."""
    lanes = _SMALL_LANES if m_elems <= (1 << 16) else _LANES
    rows_needed = _round_up(-(-m_elems // lanes), _SUBLANES)

    n_2d = 2 + (1 if need_obs else 0) + (1 if emit_elp else 0) + (1 if emit_lml else 0)
    n_3d = num_samples * (2 if emit_samples else 1)
    bytes_per_row = (n_2d + n_3d) * lanes * 4
    budget = 24 * 1024 * 1024                       # double-buffered block budget
    max_rows_vmem = max(_SUBLANES, budget // (2 * bytes_per_row))

    tile_r = _SUBLANES
    while (tile_r * 2 <= _MAX_TILE_ROWS
           and tile_r * 2 <= max_rows_vmem
           and rows_needed > tile_r * 2):           # keep >= 2 grid steps
        tile_r *= 2
    return lanes, tile_r


def _make_kernel(noise, num_samples, tile_r, emit_samples, emit_elp, emit_lml):
    """Fused rsample -> Gaussian log_prob -> mean / online-logsumexp over S."""
    need_obs = emit_elp or emit_lml
    neg_a = -0.5 / float(noise)                      # -1/(2*noise)
    log_term = math.log(float(noise)) + _LOG_2PI     # log(noise) + log(2*pi)
    inv_s = 1.0 / num_samples
    log_s = math.log(num_samples)
    num_slabs = tile_r // _SUBLANES

    def kernel(*refs):
        it = iter(refs)
        mean_ref = next(it)
        var_ref = next(it)
        obs_ref = next(it) if need_obs else None
        eps_ref = next(it)
        samples_ref = next(it) if emit_samples else None
        elp_ref = next(it) if emit_elp else None
        lml_ref = next(it) if emit_lml else None

        def slab_body(si):
            if isinstance(si, int):
                r0 = si * _SUBLANES
            else:
                r0 = pl.multiple_of(si * _SUBLANES, _SUBLANES)
            rows = pl.ds(r0, _SUBLANES)

            mean = mean_ref[rows, :]
            std = jnp.sqrt(var_ref[rows, :])
            obs = obs_ref[rows, :] if need_obs else None

            sum_d2 = None   # running sum of squared residuals   (elp)
            m = None        # running min of d2 (== max log-prob) (lml)
            zsum = None     # running rescaled exp-sum            (lml)

            for s in range(num_samples):
                f = mean + std * eps_ref[s, rows, :]
                if emit_samples:
                    samples_ref[s, rows, :] = f
                if need_obs:
                    diff = obs - f
                    d2 = diff * diff
                    if s == 0:
                        if emit_elp:
                            sum_d2 = d2
                        if emit_lml:
                            m = d2
                            zsum = jnp.ones_like(d2)
                    else:
                        if emit_elp:
                            sum_d2 = sum_d2 + d2
                        if emit_lml:
                            # single exp per step: only one logsumexp factor != 1
                            e = jnp.exp(neg_a * jnp.abs(d2 - m))
                            zsum = jnp.where(d2 >= m, zsum + e, zsum * e + 1.0)
                            m = jnp.minimum(m, d2)

            if emit_elp:
                # expected_log_prob: mean_s[-0.5*(d2/noise + log_term)]
                elp_ref[rows, :] = (neg_a * inv_s) * sum_d2 - 0.5 * log_term
            if emit_lml:
                # log_marginal: logsumexp_s(lp) - log(S), min-shifted for stability
                lml_ref[rows, :] = (neg_a * m - 0.5 * log_term
                                    + jnp.log(zsum) - log_s)

        if num_slabs == 1:
            slab_body(0)
        else:
            def body(si, carry):
                slab_body(si)
                return carry
            lax.fori_loop(0, num_slabs, body, 0, unroll=num_slabs <= 4)

    return kernel


def _likelihood_pallas(noise, key, mean, var, obs, num_samples,
                       emit_samples=True, emit_elp=True, emit_lml=True):
    """Host wrapper: fold (batch, N) into a padded lane-dense 2-D layout."""
    assert emit_samples or emit_elp or emit_lml
    need_obs = emit_elp or emit_lml

    orig_shape = mean.shape
    m_elems = int(mean.size)
    s = int(num_samples)

    lanes, tile_r = _choose_layout(m_elems, s, emit_samples, need_obs,
                                   emit_elp, emit_lml)
    chunk = tile_r * lanes
    m_pad = _round_up(m_elems, chunk)
    rows = m_pad // lanes
    grid = (rows // tile_r,)

    def _prep(x):
        flat = jnp.ravel(x).astype(jnp.float32)
        flat = jnp.pad(flat, (0, m_pad - m_elems))
        return flat.reshape(rows, lanes)

    # eps drawn in flat, layout-independent order: the drawn samples do not
    # depend on the tiling heuristics (bitwise-stable across emit flags).
    eps = jax.random.normal(key, (s, m_elems), dtype=jnp.float32)
    eps = jnp.pad(eps, ((0, 0), (0, m_pad - m_elems))).reshape(s, rows, lanes)

    tile2d = pl.BlockSpec((tile_r, lanes), lambda i: (i, 0))
    tile3d = pl.BlockSpec((s, tile_r, lanes), lambda i: (0, i, 0))

    inputs = [_prep(mean), _prep(var)]
    in_specs = [tile2d, tile2d]
    if need_obs:
        inputs.append(_prep(obs))
        in_specs.append(tile2d)
    inputs.append(eps)
    in_specs.append(tile3d)

    out_shape, out_specs = [], []
    if emit_samples:
        out_shape.append(jax.ShapeDtypeStruct((s, rows, lanes), jnp.float32))
        out_specs.append(tile3d)
    if emit_elp:
        out_shape.append(jax.ShapeDtypeStruct((rows, lanes), jnp.float32))
        out_specs.append(tile2d)
    if emit_lml:
        out_shape.append(jax.ShapeDtypeStruct((rows, lanes), jnp.float32))
        out_specs.append(tile2d)

    outs = pl.pallas_call(
        _make_kernel(noise, s, tile_r, emit_samples, emit_elp, emit_lml),
        grid=grid,
        in_specs=in_specs,
        out_specs=tuple(out_specs),
        out_shape=tuple(out_shape),
        compiler_params=pltpu.CompilerParams(
            dimension_semantics=("parallel",),
            vmem_limit_bytes=48 * 1024 * 1024),
    )(*inputs)

    if not isinstance(outs, (tuple, list)):
        outs = (outs,)

    def _unpad2d(x):
        return x.reshape(-1)[:m_elems].reshape(orig_shape)

    results = {}
    i = 0
    if emit_samples:
        samp = outs[i]; i += 1
        results["samples"] = samp.reshape(s, -1)[:, :m_elems].reshape((s,) + orig_shape)
    if emit_elp:
        results["elp"] = _unpad2d(outs[i]); i += 1
    if emit_lml:
        results["lml"] = _unpad2d(outs[i]); i += 1
    return results


class GaussianLikelihoodPallas:
    """Concrete `_Likelihood` with Gaussian forward; hot paths run in Pallas."""

    has_analytic_marginal = False

    def __init__(self, noise=0.25, max_plate_nesting=1, num_likelihood_samples=10):
        self.max_plate_nesting = max_plate_nesting
        self.num_likelihood_samples = num_likelihood_samples
        self.noise = float(noise)

    def marginal(self, mean, var, key):
        # samples-only fast path: no obs read, no elp/lml outputs, no exps
        r = _likelihood_pallas(self.noise, key, mean, var, None,
                               self.num_likelihood_samples,
                               emit_samples=True, emit_elp=False, emit_lml=False)
        # returned distribution is Normal(loc=samples, scale=sqrt(noise));
        # return its loc (the likelihood samples)
        return r["samples"]

    def expected_log_prob(self, observations, mean, var, key):
        # skips the whole exp/logsumexp path
        r = _likelihood_pallas(self.noise, key, mean, var, observations,
                               self.num_likelihood_samples,
                               emit_samples=False, emit_elp=True, emit_lml=False)
        return r["elp"]

    def log_marginal(self, observations, mean, var, key):
        # skips the elp accumulation/write
        r = _likelihood_pallas(self.noise, key, mean, var, observations,
                               self.num_likelihood_samples,
                               emit_samples=False, emit_elp=False, emit_lml=True)
        return r["lml"]

    def __call__(self, mean, var, key):
        # MultivariateNormal input -> marginal predictions (spec's __call__ path)
        return self.marginal(mean, var, key)


if __name__ == "__main__":
    S, B, N = 10, 2, 128   # samples, batch, data points
    noise = 0.25
    key = jax.random.PRNGKey(0)
    k_mean, k_var, k_obs, k_eps = jax.random.split(key, 4)

    mean = jax.random.normal(k_mean, (B, N), dtype=jnp.float32)
    var = jax.nn.softplus(jax.random.normal(k_var, (B, N), dtype=jnp.float32)) + 0.1
    obs = jax.random.normal(k_obs, (B, N), dtype=jnp.float32)

    # full path: samples + expected_log_prob + log_marginal in one fused kernel
    full = _likelihood_pallas(noise, k_eps, mean, var, obs, S,
                              emit_samples=True, emit_elp=True, emit_lml=True)
    samples, elp, lml = full["samples"], full["elp"], full["lml"]
    jax.block_until_ready((samples, elp, lml))

    # Correctness: elp / lml must equal the reference formulas applied to the
    # exact samples the kernel produced.
    lp = -0.5 * ((obs[None] - samples) ** 2 / noise + math.log(noise) + _LOG_2PI)
    elp_ref = lp.mean(axis=0)
    lml_ref = jax.scipy.special.logsumexp(lp - math.log(S), axis=0)
    assert jnp.allclose(elp, elp_ref, rtol=1e-4, atol=1e-4)
    assert jnp.allclose(lml, lml_ref, rtol=1e-4, atol=1e-4)

    # rsample sanity: standardized residuals should be ~ N(0, 1).
    z = (samples - mean[None]) / jnp.sqrt(var)[None]
    assert abs(float(jnp.mean(z))) < 0.2
    assert abs(float(jnp.std(z)) - 1.0) < 0.2
    assert bool(jnp.all(jnp.isfinite(elp))) and bool(jnp.all(jnp.isfinite(lml)))

    # Per-entry-point fast paths (output skipping); same key => same eps stream.
    lik = GaussianLikelihoodPallas(noise=noise, num_likelihood_samples=S)
    samples_m = lik.marginal(mean, var, key=k_eps)
    elp_m = lik.expected_log_prob(obs, mean, var, key=k_eps)
    lml_m = lik.log_marginal(obs, mean, var, key=k_eps)
    jax.block_until_ready((samples_m, elp_m, lml_m))
    assert jnp.allclose(samples_m, samples, rtol=1e-5, atol=1e-5)
    assert jnp.allclose(elp_m, elp, rtol=1e-4, atol=1e-4)
    assert jnp.allclose(lml_m, lml, rtol=1e-4, atol=1e-4)

    print("KERNEL_OK")
</pallas_src>

<mosaic_0001>
module attributes {stable_mosaic.version = 11 : i64} {
  func.func @kernel(%arg0: i32, %arg1: memref<8x128xf32, #tpu.memory_space<vmem>>, %arg2: memref<8x128xf32, #tpu.memory_space<vmem>>, %arg3: memref<8x128xf32, #tpu.memory_space<vmem>>, %arg4: memref<10x8x128xf32, #tpu.memory_space<vmem>>, %arg5: memref<10x8x128xf32, #tpu.memory_space<vmem>>, %arg6: memref<8x128xf32, #tpu.memory_space<vmem>>, %arg7: memref<8x128xf32, #tpu.memory_space<vmem>>) attributes {dimension_semantics = [#tpu.dimension_semantics<parallel>], iteration_bounds = array<i64: 1>, scalar_prefetch = 0 : i64, scratch_operands = 0 : i64, tpu.core_type = #tpu.core_type<tc>, window_params = [{transform_indices = @transform_0, window_bounds = array<i64: 8, 128>}, {transform_indices = @transform_1, window_bounds = array<i64: 8, 128>}, {transform_indices = @transform_2, window_bounds = array<i64: 8, 128>}, {transform_indices = @transform_3, window_bounds = array<i64: 10, 8, 128>}, {transform_indices = @transform_4, window_bounds = array<i64: 10, 8, 128>}, {transform_indices = @transform_5, window_bounds = array<i64: 8, 128>}, {transform_indices = @transform_6, window_bounds = array<i64: 8, 128>}]} {
    %c0 = arith.constant 0 : index
    %c0_0 = arith.constant 0 : index
    %0 = vector.load %arg1[%c0, %c0_0] : memref<8x128xf32, #tpu.memory_space<vmem>>, vector<8x128xf32>
    %c0_1 = arith.constant 0 : index
    %c0_2 = arith.constant 0 : index
    %1 = vector.load %arg2[%c0_1, %c0_2] : memref<8x128xf32, #tpu.memory_space<vmem>>, vector<8x128xf32>
    %2 = math.sqrt %1 : vector<8x128xf32>
    %c0_3 = arith.constant 0 : index
    %c0_4 = arith.constant 0 : index
    %3 = vector.load %arg3[%c0_3, %c0_4] : memref<8x128xf32, #tpu.memory_space<vmem>>, vector<8x128xf32>
    %c0_5 = arith.constant 0 : index
    %c0_6 = arith.constant 0 : index
    %c0_7 = arith.constant 0 : index
    %4 = vector.load %arg4[%c0_5, %c0_6, %c0_7] : memref<10x8x128xf32, #tpu.memory_space<vmem>>, vector<1x8x128xf32>
    %5 = vector.shape_cast %4 : vector<1x8x128xf32> to vector<8x128xf32>
    %6 = arith.mulf %2, %5 : vector<8x128xf32>
    %7 = arith.addf %0, %6 : vector<8x128xf32>
    %c0_8 = arith.constant 0 : index
    %c0_9 = arith.constant 0 : index
    %c0_10 = arith.constant 0 : index
    %8 = vector.load %arg5[%c0_8, %c0_9, %c0_10] : memref<10x8x128xf32, #tpu.memory_space<vmem>>, vector<1x8x128xf32>
    %9 = vector.shape_cast %8 : vector<1x8x128xf32> to vector<8x128xf32>
    %10 = vector.shape_cast %7 : vector<8x128xf32> to vector<1x8x128xf32>
    tpu.vector_store %arg5[%c0_8, %c0_9, %c0_10], %10 {strides = array<i32>} : memref<10x8x128xf32, #tpu.memory_space<vmem>>, vector<1x8x128xf32>,
    %11 = arith.subf %3, %7 : vector<8x128xf32>
    %12 = arith.mulf %11, %11 : vector<8x128xf32>
    %cst = arith.constant 1.000000e+00 : f32
    %13 = vector.broadcast %cst : f32 to vector<8x128xf32>
    %c1 = arith.constant 1 : index
    %c0_11 = arith.constant 0 : index
    %c0_12 = arith.constant 0 : index
    %14 = vector.load %arg4[%c1, %c0_11, %c0_12] : memref<10x8x128xf32, #tpu.memory_space<vmem>>, vector<1x8x128xf32>
    %15 = vector.shape_cast %14 : vector<1x8x128xf32> to vector<8x128xf32>
    %16 = arith.mulf %2, %15 : vector<8x128xf32>
    %17 = arith.addf %0, %16 : vector<8x128xf32>
    %c1_13 = arith.constant 1 : index
    %c0_14 = arith.constant 0 : index
    %c0_15 = arith.constant 0 : index
    %18 = vector.load %arg5[%c1_13, %c0_14, %c0_15] : memref<10x8x128xf32, #tpu.memory_space<vmem>>, vector<1x8x128xf32>
    %19 = vector.shape_cast %18 : vector<1x8x128xf32> to vector<8x128xf32>
    %20 = vector.shape_cast %17 : vector<8x128xf32> to vector<1x8x128xf32>
    tpu.vector_store %arg5[%c1_13, %c0_14, %c0_15], %20 {strides = array<i32>} : memref<10x8x128xf32, #tpu.memory_space<vmem>>, vector<1x8x128xf32>,
    %21 = arith.subf %3, %17 : vector<8x128xf32>
    %22 = arith.mulf %21, %21 : vector<8x128xf32>
    %23 = arith.addf %12, %22 : vector<8x128xf32>
    %24 = arith.subf %22, %12 : vector<8x128xf32>
    %25 = math.absf %24 : vector<8x128xf32>
    %cst_16 = arith.constant -2.000000e+00 : f32
    %26 = vector.broadcast %cst_16 : f32 to vector<8x128xf32>
    %27 = arith.mulf %26, %25 : vector<8x128xf32>
    %28 = math.exp %27 : vector<8x128xf32>
    %29 = arith.cmpf oge, %22, %12 : vector<8x128xf32>
    %30 = arith.addf %13, %28 : vector<8x128xf32>
    %31 = arith.mulf %13, %28 : vector<8x128xf32>
    %cst_17 = arith.constant 1.000000e+00 : f32
    %32 = vector.broadcast %cst_17 : f32 to vector<8x128xf32>
    %33 = arith.addf %31, %32 : vector<8x128xf32>
    %34 = arith.select %29, %30, %33 : vector<8x128xi1>, vector<8x128xf32>
    %35 = arith.minimumf %12, %22 : vector<8x128xf32>
    %c2 = arith.constant 2 : index
    %c0_18 = arith.constant 0 : index
    %c0_19 = arith.constant 0 : index
    %36 = vector.load %arg4[%c2, %c0_18, %c0_19] : memref<10x8x128xf32, #tpu.memory_space<vmem>>, vector<1x8x128xf32>
    %37 = vector.shape_cast %36 : vector<1x8x128xf32> to vector<8x128xf32>
    %38 = arith.mulf %2, %37 : vector<8x128xf32>
    %39 = arith.addf %0, %38 : vector<8x128xf32>
    %c2_20 = arith.constant 2 : index
    %c0_21 = arith.constant 0 : index
    %c0_22 = arith.constant 0 : index
    %40 = vector.load %arg5[%c2_20, %c0_21, %c0_22] : memref<10x8x128xf32, #tpu.memory_space<vmem>>, vector<1x8x128xf32>
    %41 = vector.shape_cast %40 : vector<1x8x128xf32> to vector<8x128xf32>
    %42 = vector.shape_cast %39 : vector<8x128xf32> to vector<1x8x128xf32>
    tpu.vector_store %arg5[%c2_20, %c0_21, %c0_22], %42 {strides = array<i32>} : memref<10x8x128xf32, #tpu.memory_space<vmem>>, vector<1x8x128xf32>,
    %43 = arith.subf %3, %39 : vector<8x128xf32>
    %44 = arith.mulf %43, %43 : vector<8x128xf32>
    %45 = arith.addf %23, %44 : vector<8x128xf32>
    %46 = arith.subf %44, %35 : vector<8x128xf32>
    %47 = math.absf %46 : vector<8x128xf32>
    %cst_23 = arith.constant -2.000000e+00 : f32
    %48 = vector.broadcast %cst_23 : f32 to vector<8x128xf32>
    %49 = arith.mulf %48, %47 : vector<8x128xf32>
    %50 = math.exp %49 : vector<8x128xf32>
    %51 = arith.cmpf oge, %44, %35 : vector<8x128xf32>
    %52 = arith.addf %34, %50 : vector<8x128xf32>
    %53 = arith.mulf %34, %50 : vector<8x128xf32>
    %cst_24 = arith.constant 1.000000e+00 : f32
    %54 = vector.broadcast %cst_24 : f32 to vector<8x128xf32>
    %55 = arith.addf %53, %54 : vector<8x128xf32>
    %56 = arith.select %51, %52, %55 : vector<8x128xi1>, vector<8x128xf32>
    %57 = arith.minimumf %35, %44 : vector<8x128xf32>
    %c3 = arith.constant 3 : index
    %c0_25 = arith.constant 0 : index
    %c0_26 = arith.constant 0 : index
    %58 = vector.load %arg4[%c3, %c0_25, %c0_26] : memref<10x8x128xf32, #tpu.memory_space<vmem>>, vector<1x8x128xf32>
    %59 = vector.shape_cast %58 : vector<1x8x128xf32> to vector<8x128xf32>
    %60 = arith.mulf %2, %59 : vector<8x128xf32>
    %61 = arith.addf %0, %60 : vector<8x128xf32>
    %c3_27 = arith.constant 3 : index
    %c0_28 = arith.constant 0 : index
    %c0_29 = arith.constant 0 : index
    %62 = vector.load %arg5[%c3_27, %c0_28, %c0_29] : memref<10x8x128xf32, #tpu.memory_space<vmem>>, vector<1x8x128xf32>
    %63 = vector.shape_cast %62 : vector<1x8x128xf32> to vector<8x128xf32>
    %64 = vector.shape_cast %61 : vector<8x128xf32> to vector<1x8x128xf32>
    tpu.vector_store %arg5[%c3_27, %c0_28, %c0_29], %64 {strides = array<i32>} : memref<10x8x128xf32, #tpu.memory_space<vmem>>, vector<1x8x128xf32>,
    %65 = arith.subf %3, %61 : vector<8x128xf32>
    %66 = arith.mulf %65, %65 : vector<8x128xf32>
    %67 = arith.addf %45, %66 : vector<8x128xf32>
    %68 = arith.subf %66, %57 : vector<8x128xf32>
    %69 = math.absf %68 : vector<8x128xf32>
    %cst_30 = arith.constant -2.000000e+00 : f32
    %70 = vector.broadcast %cst_30 : f32 to vector<8x128xf32>
    %71 = arith.mulf %70, %69 : vector<8x128xf32>
    %72 = math.exp %71 : vector<8x128xf32>
    %73 = arith.cmpf oge, %66, %57 : vector<8x128xf32>
    %74 = arith.addf %56, %72 : vector<8x128xf32>
    %75 = arith.mulf %56, %72 : vector<8x128xf32>
    %cst_31 = arith.constant 1.000000e+00 : f32
    %76 = vector.broadcast %cst_31 : f32 to vector<8x128xf32>
    %77 = arith.addf %75, %76 : vector<8x128xf32>
    %78 = arith.select %73, %74, %77 : vector<8x128xi1>, vector<8x128xf32>
    %79 = arith.minimumf %57, %66 : vector<8x128xf32>
    %c4 = arith.constant 4 : index
    %c0_32 = arith.constant 0 : index
    %c0_33 = arith.constant 0 : index
    %80 = vector.load %arg4[%c4, %c0_32, %c0_33] : memref<10x8x128xf32, #tpu.memory_space<vmem>>, vector<1x8x128xf32>
    %81 = vector.shape_cast %80 : vector<1x8x128xf32> to vector<8x128xf32>
    %82 = arith.mulf %2, %81 : vector<8x128xf32>
    %83 = arith.addf %0, %82 : vector<8x128xf32>
    %c4_34 = arith.constant 4 : index
    %c0_35 = arith.constant 0 : index
    %c0_36 = arith.constant 0 : index
    %84 = vector.load %arg5[%c4_34, %c0_35, %c0_36] : memref<10x8x128xf32, #tpu.memory_space<vmem>>, vector<1x8x128xf32>
    %85 = vector.shape_cast %84 : vector<1x8x128xf32> to vector<8x128xf32>
    %86 = vector.shape_cast %83 : vector<8x128xf32> to vector<1x8x128xf32>
    tpu.vector_store %arg5[%c4_34, %c0_35, %c0_36], %86 {strides = array<i32>} : memref<10x8x128xf32, #tpu.memory_space<vmem>>, vector<1x8x128xf32>,
    %87 = arith.subf %3, %83 : vector<8x128xf32>
    %88 = arith.mulf %87, %87 : vector<8x128xf32>
    %89 = arith.addf %67, %88 : vector<8x128xf32>
    %90 = arith.subf %88, %79 : vector<8x128xf32>
    %91 = math.absf %90 : vector<8x128xf32>
    %cst_37 = arith.constant -2.000000e+00 : f32
    %92 = vector.broadcast %cst_37 : f32 to vector<8x128xf32>
    %93 = arith.mulf %92, %91 : vector<8x128xf32>
    %94 = math.exp %93 : vector<8x128xf32>
    %95 = arith.cmpf oge, %88, %79 : vector<8x128xf32>
    %96 = arith.addf %78, %94 : vector<8x128xf32>
    %97 = arith.mulf %78, %94 : vector<8x128xf32>
    %cst_38 = arith.constant 1.000000e+00 : f32
    %98 = vector.broadcast %cst_38 : f32 to vector<8x128xf32>
    %99 = arith.addf %97, %98 : vector<8x128xf32>
    %100 = arith.select %95, %96, %99 : vector<8x128xi1>, vector<8x128xf32>
    %101 = arith.minimumf %79, %88 : vector<8x128xf32>
    %c5 = arith.constant 5 : index
    %c0_39 = arith.constant 0 : index
    %c0_40 = arith.constant 0 : index
    %102 = vector.load %arg4[%c5, %c0_39, %c0_40] : memref<10x8x128xf32, #tpu.memory_space<vmem>>, vector<1x8x128xf32>
    %103 = vector.shape_cast %102 : vector<1x8x128xf32> to vector<8x128xf32>
    %104 = arith.mulf %2, %103 : vector<8x128xf32>
    %105 = arith.addf %0, %104 : vector<8x128xf32>
    %c5_41 = arith.constant 5 : index
    %c0_42 = arith.constant 0 : index
    %c0_43 = arith.constant 0 : index
    %106 = vector.load %arg5[%c5_41, %c0_42, %c0_43] : memref<10x8x128xf32, #tpu.memory_space<vmem>>, vector<1x8x128xf32>
    %107 = vector.shape_cast %106 : vector<1x8x128xf32> to vector<8x128xf32>
    %108 = vector.shape_cast %105 : vector<8x128xf32> to vector<1x8x128xf32>
    tpu.vector_store %arg5[%c5_41, %c0_42, %c0_43], %108 {strides = array<i32>} : memref<10x8x128xf32, #tpu.memory_space<vmem>>, vector<1x8x128xf32>,
    %109 = arith.subf %3, %105 : vector<8x128xf32>
    %110 = arith.mulf %109, %109 : vector<8x128xf32>
    %111 = arith.addf %89, %110 : vector<8x128xf32>
    %112 = arith.subf %110, %101 : vector<8x128xf32>
    %113 = math.absf %112 : vector<8x128xf32>
    %cst_44 = arith.constant -2.000000e+00 : f32
    %114 = vector.broadcast %cst_44 : f32 to vector<8x128xf32>
    %115 = arith.mulf %114, %113 : vector<8x128xf32>
    %116 = math.exp %115 : vector<8x128xf32>
    %117 = arith.cmpf oge, %110, %101 : vector<8x128xf32>
    %118 = arith.addf %100, %116 : vector<8x128xf32>
    %119 = arith.mulf %100, %116 : vector<8x128xf32>
    %cst_45 = arith.constant 1.000000e+00 : f32
    %120 = vector.broadcast %cst_45 : f32 to vector<8x128xf32>
    %121 = arith.addf %119, %120 : vector<8x128xf32>
    %122 = arith.select %117, %118, %121 : vector<8x128xi1>, vector<8x128xf32>
    %123 = arith.minimumf %101, %110 : vector<8x128xf32>
    %c6 = arith.constant 6 : index
    %c0_46 = arith.constant 0 : index
    %c0_47 = arith.constant 0 : index
    %124 = vector.load %arg4[%c6, %c0_46, %c0_47] : memref<10x8x128xf32, #tpu.memory_space<vmem>>, vector<1x8x128xf32>
    %125 = vector.shape_cast %124 : vector<1x8x128xf32> to vector<8x128xf32>
    %126 = arith.mulf %2, %125 : vector<8x128xf32>
    %127 = arith.addf %0, %126 : vector<8x128xf32>
    %c6_48 = arith.constant 6 : index
    %c0_49 = arith.constant 0 : index
    %c0_50 = arith.constant 0 : index
    %128 = vector.load %arg5[%c6_48, %c0_49, %c0_50] : memref<10x8x128xf32, #tpu.memory_space<vmem>>, vector<1x8x128xf32>
    %129 = vector.shape_cast %128 : vector<1x8x128xf32> to vector<8x128xf32>
    %130 = vector.shape_cast %127 : vector<8x128xf32> to vector<1x8x128xf32>
    tpu.vector_store %arg5[%c6_48, %c0_49, %c0_50], %130 {strides = array<i32>} : memref<10x8x128xf32, #tpu.memory_space<vmem>>, vector<1x8x128xf32>,
    %131 = arith.subf %3, %127 : vector<8x128xf32>
    %132 = arith.mulf %131, %131 : vector<8x128xf32>
    %133 = arith.addf %111, %132 : vector<8x128xf32>
    %134 = arith.subf %132, %123 : vector<8x128xf32>
    %135 = math.absf %134 : vector<8x128xf32>
    %cst_51 = arith.constant -2.000000e+00 : f32
    %136 = vector.broadcast %cst_51 : f32 to vector<8x128xf32>
    %137 = arith.mulf %136, %135 : vector<8x128xf32>
    %138 = math.exp %137 : vector<8x128xf32>
    %139 = arith.cmpf oge, %132, %123 : vector<8x128xf32>
    %140 = arith.addf %122, %138 : vector<8x128xf32>
    %141 = arith.mulf %122, %138 : vector<8x128xf32>
    %cst_52 = arith.constant 1.000000e+00 : f32
    %142 = vector.broadcast %cst_52 : f32 to vector<8x128xf32>
    %143 = arith.addf %141, %142 : vector<8x128xf32>
    %144 = arith.select %139, %140, %143 : vector<8x128xi1>, vector<8x128xf32>
    %145 = arith.minimumf %123, %132 : vector<8x128xf32>
    %c7 = arith.constant 7 : index
    %c0_53 = arith.constant 0 : index
    %c0_54 = arith.constant 0 : index
    %146 = vector.load %arg4[%c7, %c0_53, %c0_54] : memref<10x8x128xf32, #tpu.memory_space<vmem>>, vector<1x8x128xf32>
    %147 = vector.shape_cast %146 : vector<1x8x128xf32> to vector<8x128xf32>
    %148 = arith.mulf %2, %147 : vector<8x128xf32>
    %149 = arith.addf %0, %148 : vector<8x128xf32>
    %c7_55 = arith.constant 7 : index
    %c0_56 = arith.constant 0 : index
    %c0_57 = arith.constant 0 : index
    %150 = vector.load %arg5[%c7_55, %c0_56, %c0_57] : memref<10x8x128xf32, #tpu.memory_space<vmem>>, vector<1x8x128xf32>
    %151 = vector.shape_cast %150 : vector<1x8x128xf32> to vector<8x128xf32>
    %152 = vector.shape_cast %149 : vector<8x128xf32> to vector<1x8x128xf32>
    tpu.vector_store %arg5[%c7_55, %c0_56, %c0_57], %152 {strides = array<i32>} : memref<10x8x128xf32, #tpu.memory_space<vmem>>, vector<1x8x128xf32>,
    %153 = arith.subf %3, %149 : vector<8x128xf32>
    %154 = arith.mulf %153, %153 : vector<8x128xf32>
    %155 = arith.addf %133, %154 : vector<8x128xf32>
    %156 = arith.subf %154, %145 : vector<8x128xf32>
    %157 = math.absf %156 : vector<8x128xf32>
    %cst_58 = arith.constant -2.000000e+00 : f32
    %158 = vector.broadcast %cst_58 : f32 to vector<8x128xf32>
    %159 = arith.mulf %158, %157 : vector<8x128xf32>
    %160 = math.exp %159 : vector<8x128xf32>
    %161 = arith.cmpf oge, %154, %145 : vector<8x128xf32>
    %162 = arith.addf %144, %160 : vector<8x128xf32>
    %163 = arith.mulf %144, %160 : vector<8x128xf32>
    %cst_59 = arith.constant 1.000000e+00 : f32
    %164 = vector.broadcast %cst_59 : f32 to vector<8x128xf32>
    %165 = arith.addf %163, %164 : vector<8x128xf32>
    %166 = arith.select %161, %162, %165 : vector<8x128xi1>, vector<8x128xf32>
    %167 = arith.minimumf %145, %154 : vector<8x128xf32>
    %c8 = arith.constant 8 : index
    %c0_60 = arith.constant 0 : index
    %c0_61 = arith.constant 0 : index
    %168 = vector.load %arg4[%c8, %c0_60, %c0_61] : memref<10x8x128xf32, #tpu.memory_space<vmem>>, vector<1x8x128xf32>
    %169 = vector.shape_cast %168 : vector<1x8x128xf32> to vector<8x128xf32>
    %170 = arith.mulf %2, %169 : vector<8x128xf32>
    %171 = arith.addf %0, %170 : vector<8x128xf32>
    %c8_62 = arith.constant 8 : index
    %c0_63 = arith.constant 0 : index
    %c0_64 = arith.constant 0 : index
    %172 = vector.load %arg5[%c8_62, %c0_63, %c0_64] : memref<10x8x128xf32, #tpu.memory_space<vmem>>, vector<1x8x128xf32>
    %173 = vector.shape_cast %172 : vector<1x8x128xf32> to vector<8x128xf32>
    %174 = vector.shape_cast %171 : vector<8x128xf32> to vector<1x8x128xf32>
    tpu.vector_store %arg5[%c8_62, %c0_63, %c0_64], %174 {strides = array<i32>} : memref<10x8x128xf32, #tpu.memory_space<vmem>>, vector<1x8x128xf32>,
    %175 = arith.subf %3, %171 : vector<8x128xf32>
    %176 = arith.mulf %175, %175 : vector<8x128xf32>
    %177 = arith.addf %155, %176 : vector<8x128xf32>
    %178 = arith.subf %176, %167 : vector<8x128xf32>
    %179 = math.absf %178 : vector<8x128xf32>
    %cst_65 = arith.constant -2.000000e+00 : f32
    %180 = vector.broadcast %cst_65 : f32 to vector<8x128xf32>
    %181 = arith.mulf %180, %179 : vector<8x128xf32>
    %182 = math.exp %181 : vector<8x128xf32>
    %183 = arith.cmpf oge, %176, %167 : vector<8x128xf32>
    %184 = arith.addf %166, %182 : vector<8x128xf32>
    %185 = arith.mulf %166, %182 : vector<8x128xf32>
    %cst_66 = arith.constant 1.000000e+00 : f32
    %186 = vector.broadcast %cst_66 : f32 to vector<8x128xf32>
    %187 = arith.addf %185, %186 : vector<8x128xf32>
    %188 = arith.select %183, %184, %187 : vector<8x128xi1>, vector<8x128xf32>
    %189 = arith.minimumf %167, %176 : vector<8x128xf32>
    %c9 = arith.constant 9 : index
    %c0_67 = arith.constant 0 : index
    %c0_68 = arith.constant 0 : index
    %190 = vector.load %arg4[%c9, %c0_67, %c0_68] : memref<10x8x128xf32, #tpu.memory_space<vmem>>, vector<1x8x128xf32>
    %191 = vector.shape_cast %190 : vector<1x8x128xf32> to vector<8x128xf32>
    %192 = arith.mulf %2, %191 : vector<8x128xf32>
    %193 = arith.addf %0, %192 : vector<8x128xf32>
    %c9_69 = arith.constant 9 : index
    %c0_70 = arith.constant 0 : index
    %c0_71 = arith.constant 0 : index
    %194 = vector.load %arg5[%c9_69, %c0_70, %c0_71] : memref<10x8x128xf32, #tpu.memory_space<vmem>>, vector<1x8x128xf32>
    %195 = vector.shape_cast %194 : vector<1x8x128xf32> to vector<8x128xf32>
    %196 = vector.shape_cast %193 : vector<8x128xf32> to vector<1x8x128xf32>
    tpu.vector_store %arg5[%c9_69, %c0_70, %c0_71], %196 {strides = array<i32>} : memref<10x8x128xf32, #tpu.memory_space<vmem>>, vector<1x8x128xf32>,
    %197 = arith.subf %3, %193 : vector<8x128xf32>
    %198 = arith.mulf %197, %197 : vector<8x128xf32>
    %199 = arith.addf %177, %198 : vector<8x128xf32>
    %200 = arith.subf %198, %189 : vector<8x128xf32>
    %201 = math.absf %200 : vector<8x128xf32>
    %cst_72 = arith.constant -2.000000e+00 : f32
    %202 = vector.broadcast %cst_72 : f32 to vector<8x128xf32>
    %203 = arith.mulf %202, %201 : vector<8x128xf32>
    %204 = math.exp %203 : vector<8x128xf32>
    %205 = arith.cmpf oge, %198, %189 : vector<8x128xf32>
    %206 = arith.addf %188, %204 : vector<8x128xf32>
    %207 = arith.mulf %188, %204 : vector<8x128xf32>
    %cst_73 = arith.constant 1.000000e+00 : f32
    %208 = vector.broadcast %cst_73 : f32 to vector<8x128xf32>
    %209 = arith.addf %207, %208 : vector<8x128xf32>
    %210 = arith.select %205, %206, %209 : vector<8x128xi1>, vector<8x128xf32>
    %211 = arith.minimumf %189, %198 : vector<8x128xf32>
    %cst_74 = arith.constant -2.000000e-01 : f32
    %212 = vector.broadcast %cst_74 : f32 to vector<8x128xf32>
    %213 = arith.mulf %212, %199 : vector<8x128xf32>
    %cst_75 = arith.constant 0.22579135 : f32
    %214 = vector.broadcast %cst_75 : f32 to vector<8x128xf32>
    %215 = arith.subf %213, %214 : vector<8x128xf32>
    %c0_76 = arith.constant 0 : index
    %c0_77 = arith.constant 0 : index
    %216 = vector.load %arg6[%c0_76, %c0_77] : memref<8x128xf32, #tpu.memory_space<vmem>>, vector<8x128xf32>
    tpu.vector_store %arg6[%c0_76, %c0_77], %215 {strides = array<i32>} : memref<8x128xf32, #tpu.memory_space<vmem>>, vector<8x128xf32>,
    %cst_78 = arith.constant -2.000000e+00 : f32
    %217 = vector.broadcast %cst_78 : f32 to vector<8x128xf32>
    %218 = arith.mulf %217, %211 : vector<8x128xf32>
    %cst_79 = arith.constant 0.22579135 : f32
    %219 = vector.broadcast %cst_79 : f32 to vector<8x128xf32>
    %220 = arith.subf %218, %219 : vector<8x128xf32>
    %221 = math.log %210 : vector<8x128xf32>
    %222 = arith.addf %220, %221 : vector<8x128xf32>
    %cst_80 = arith.constant 2.30258512 : f32
    %223 = vector.broadcast %cst_80 : f32 to vector<8x128xf32>
    %224 = arith.subf %222, %223 : vector<8x128xf32>
    %c0_81 = arith.constant 0 : index
    %c0_82 = arith.constant 0 : index
    %225 = vector.load %arg7[%c0_81, %c0_82] : memref<8x128xf32, #tpu.memory_space<vmem>>, vector<8x128xf32>
    tpu.vector_store %arg7[%c0_81, %c0_82], %224 {strides = array<i32>} : memref<8x128xf32, #tpu.memory_space<vmem>>, vector<8x128xf32>,
    return
  }
  func.func @transform_0(%arg0: i32) -> (i32, i32) {
    %c0_i32 = arith.constant 0 : i32
    %c0_i32_0 = arith.constant 0 : i32
    return %arg0, %c0_i32 : i32, i32
  }
  func.func @transform_1(%arg0: i32) -> (i32, i32) {
    %c0_i32 = arith.constant 0 : i32
    %c0_i32_0 = arith.constant 0 : i32
    return %arg0, %c0_i32 : i32, i32
  }
  func.func @transform_2(%arg0: i32) -> (i32, i32) {
    %c0_i32 = arith.constant 0 : i32
    %c0_i32_0 = arith.constant 0 : i32
    return %arg0, %c0_i32 : i32, i32
  }
  func.func @transform_3(%arg0: i32) -> (i32, i32, i32) {
    %c0_i32 = arith.constant 0 : i32
    %c0_i32_0 = arith.constant 0 : i32
    %c0_i32_1 = arith.constant 0 : i32
    return %c0_i32, %arg0, %c0_i32_0 : i32, i32, i32
  }
  func.func @transform_4(%arg0: i32) -> (i32, i32, i32) {
    %c0_i32 = arith.constant 0 : i32
    %c0_i32_0 = arith.constant 0 : i32
    %c0_i32_1 = arith.constant 0 : i32
    return %c0_i32, %arg0, %c0_i32_0 : i32, i32, i32
  }
  func.func @transform_5(%arg0: i32) -> (i32, i32) {
    %c0_i32 = arith.constant 0 : i32
    %c0_i32_0 = arith.constant 0 : i32
    return %arg0, %c0_i32 : i32, i32
  }
  func.func @transform_6(%arg0: i32) -> (i32, i32) {
    %c0_i32 = arith.constant 0 : i32
    %c0_i32_0 = arith.constant 0 : i32
    return %arg0, %c0_i32 : i32, i32
  }
}

</mosaic_0001>

<bundles_post_ra>
// kernel: tpu_custom_call.1
= control target key start
LH: loop header
LB: loop body
LE: loop exit
PB: predicated region body
PF: predicated region fallthrough
CT: control target
= control target key end

     0   :  { %12 = vsyncpa [#allocation3], 0  ;;  %s674_s0 = inlined_call_operand.hbm [shape: f32[8,128], index: 0, kind: input, shape index: {}]   ;;  %s675_s1 = inlined_call_operand.hbm [shape: f32[8,128], index: 1, kind: input, shape index: {}]   ;;  %s676_s2 = inlined_call_operand.hbm [shape: f32[8,128], index: 2, kind: input, shape index: {}]   ;;  %s677_s3 = inlined_call_operand.hbm [shape: f32[10,8,128], index: 3, kind: input, shape index: {}]   ;;  %s678_s4 = inlined_call_operand.hbm [shape: f32[10,8,128], index: 4, kind: output, shape index: {0}]   ;;  %s679_s5 = inlined_call_operand.hbm [shape: f32[8,128], index: 5, kind: output, shape index: {1}]   ;;  %s680_s6 = inlined_call_operand.hbm [shape: f32[8,128], index: 6, kind: output, shape index: {2}]  }
   0x1   :  { %13 = vsyncpa [#allocation6], 0 }
   0x2   :  { %14 = vsyncpa [#allocation9], 0 }
   0x3   :  { %15 = vsyncpa [#allocation4], 0 }
   0x4   :  { %16 = vsyncpa [#allocation12], 0  ;;  %s503_s21 = smov [#allocation5]   ;;  %s504_s23 = smov [#allocation2]  }
   0x5   :  { %s33_s22 = sshll.u32 %s503_s21, 4  ;;  %s23_s24 = sshll.u32 %s504_s23, 4  ;;  %s34_s22 = int_to_ptr.vmem [resolvable:$true] %s33_s22  ;;  %s24_s24 = int_to_ptr.vmem [resolvable:$true] %s23_s24 }
   0x6   :  { %s361_s25 = scalar_lea.vmem %s34_s22, 128  ;;  %p366_p1 = scmp.lt.s32.totalorder %s34_s22, %s34_s22 }
   0x7   :  { %p362_p0 = scmp.ne.s32.totalorder %s34_s22, %s361_s25  ;;  %p367_p2 = scmp.lt.s32.totalorder %s361_s25, %s361_s25 }
   0x9   :  { %p368_p3 = por %p367_p2, %p366_p1 }
   0xb   :  { %p369_p4 = pnand %p368_p3, %p362_p0 }
   0xd   :  { %372 = shalt.err (!%p369_p4)
}
   0xe   :  { %36 = dma.hbm_to_vmem [thread:$0]  %s675_s1, 128, %s34_s22, [#allocation6]  }
   0xf   :  { %s381_s28 = scalar_lea.vmem %s24_s24, 128  ;;  %p386_p6 = scmp.lt.s32.totalorder %s24_s24, %s24_s24 }
  0x10   :  { %p382_p5 = scmp.ne.s32.totalorder %s24_s24, %s381_s28  ;;  %p387_p7 = scmp.lt.s32.totalorder %s381_s28, %s381_s28 }
  0x12   :  { %p388_p8 = por %p387_p7, %p386_p6 }
  0x14   :  { %p389_p9 = pnand %p388_p8, %p382_p5 }
  0x16   :  { %392 = shalt.err (!%p389_p9)
}
  0x17   :  { %26 = dma.hbm_to_vmem [thread:$0]  %s674_s0, 128, %s24_s24, [#allocation3]  }
  0x18   :  { %s505_s7 = smov [#allocation7]   ;;  %s506_s9 = smov [#allocation8]  }
  0x19   :  { %s43_s8 = sshll.u32 %s505_s7, 4  ;;  %s52_s10 = sshll.u32 %s506_s9, 4  ;;  %s44_s8 = int_to_ptr.vmem [resolvable:$true] %s43_s8  ;;  %s53_s10 = int_to_ptr.vmem [resolvable:$true] %s52_s10 }
  0x1a   :  { %s401_s11 = scalar_lea.vmem %s44_s8, 128  ;;  %p406_p11 = scmp.lt.s32.totalorder %s44_s8, %s44_s8 }
  0x1b   :  { %p402_p10 = scmp.ne.s32.totalorder %s44_s8, %s401_s11  ;;  %p407_p12 = scmp.lt.s32.totalorder %s401_s11, %s401_s11 }
  0x1d   :  { %p408_p13 = por %p407_p12, %p406_p11 }
  0x1f   :  { %p409_p0 = pnand %p408_p13, %p402_p10 }
  0x21   :  { %412 = shalt.err (!%p409_p0)
}
  0x22   :  { %46 = dma.hbm_to_vmem [thread:$0]  %s676_s2, 128, %s44_s8, [#allocation6]  }
  0x23   :  { %s421_s13 = scalar_lea.vmem %s53_s10, 1280  ;;  %p426_p2 = scmp.lt.s32.totalorder %s53_s10, %s53_s10 }
  0x24   :  { %p422_p1 = scmp.ne.s32.totalorder %s53_s10, %s421_s13  ;;  %p427_p3 = scmp.lt.s32.totalorder %s421_s13, %s421_s13 }
  0x26   :  { %p428_p4 = por %p427_p3, %p426_p2 }
  0x28   :  { %p429_p5 = pnand %p428_p4, %p422_p1 }
  0x2a   :  { %432 = shalt.err (!%p429_p5)
}
  0x2b   :  { %s507_s0 = smov 128   ;;  %s508_s14 = smov 8  }
  0x2c   :  { %58 = dma.hbm_to_vmem [thread:$0]  %s677_s3, 1280, %s53_s10, [#allocation9], %s507_s0, %s507_s0, %s508_s14  }
  0x2d   :  { %493 = dma.done.wait [#allocation3], 128  }
  0x2e   :  { %494 = vsyncadd [#allocation3], 4294967168 }
  0x2f   :  { %495 = dma.done.wait [#allocation6], 256  }
  0x30   :  { %496 = vsyncadd [#allocation6], 4294967040 }
  0x31   :  { %497 = dma.done.wait [#allocation9], 1280  }
  0x32   :  { %498 = vsyncadd [#allocation9], 4294966016  ;;  %v72_v0 = vld [vmem:[#allocation5] sm:$0xff]  ;;  %v81_v4 = vld [vmem:[#allocation8] sm:$0xff]  ;;  %s509_s2 = smov [#allocation10]  }
  0x33   :  { %331 = vrsqrt.f32 %v72_v0  ;;  %vm75_vm0 = vcmp.eq.f32.partialorder %v72_v0, inf  ;;  %v78_v2 = vand.u32 2147483648, %v72_v0  ;;  %vm77_vm1 = vcmp.eq.f32.partialorder %v72_v0, 0.0  ;;  %v88_v5 = vld [vmem:[#allocation8 + $0x8] sm:$0xff]  ;;  %v104_v6 = vld [vmem:[#allocation8 + $0x10] sm:$0xff]  ;;  %v124_v7 = vld [vmem:[#allocation8 + $0x18] sm:$0xff] }
  0x34   :  { %v144_v8 = vld [vmem:[#allocation8 + $0x20] sm:$0xff]  ;;  %v164_v10 = vld [vmem:[#allocation8 + $0x28] sm:$0xff]  ;;  %v184_v11 = vld [vmem:[#allocation8 + $0x30] sm:$0xff]  ;;  %s278_s3 = sshll.u32 %s509_s2, 4  ;;  %s279_s3 = int_to_ptr.vmem [resolvable:$true] %s278_s3 }
  0x35   :  { %v204_v12 = vld [vmem:[#allocation8 + $0x38] sm:$0xff]  ;;  %v71_v13 = vld [vmem:[#allocation2] sm:$0xff]  ;;  %v224_v36 = vld [vmem:[#allocation8 + $0x40] sm:$0xff]  ;;  %s433_s17 = scalar_lea.vmem %s279_s3, 1280  ;;  %p438_p7 = scmp.lt.s32.totalorder %s279_s3, %s279_s3 }
  0x36   :  { %v562_v19 = vld [vmem:[#allocation7] sm:$0xff]  ;;  %v244_v40 = vld [vmem:[#allocation8 + $0x48] sm:$0xff]  ;;  %p434_p6 = scmp.ne.s32.totalorder %s279_s3, %s433_s17  ;;  %p439_p8 = scmp.lt.s32.totalorder %s433_s17, %s433_s17 }
  0x38   :  { %p440_p9 = por %p439_p8, %p438_p7 }
  0x3a   :  { %p441_p10 = pnand %p440_p9, %p434_p6 }
  0x40   :  { %v332_v1 = vpop.eup %331 }
  0x41   :  { %v74_v3 = vmul.f32 %v332_v1, %v72_v0 }
  0x43   :  { %v76_v9 = vsel %vm75_vm0, %v72_v0, %v74_v3 }
  0x44   :  { %v79_v14 = vsel %vm77_vm1, %v78_v2, %v76_v9 }
  0x45   :  { %v82_v15 = vmul.f32 %v81_v4, %v79_v14  ;;  %v89_v16 = vmul.f32 %v88_v5, %v79_v14  ;;  %v105_v17 = vmul.f32 %v104_v6, %v79_v14  ;;  %v125_v18 = vmul.f32 %v124_v7, %v79_v14 }
  0x46   :  { %v145_v20 = vmul.f32 %v144_v8, %v79_v14  ;;  %v165_v21 = vmul.f32 %v164_v10, %v79_v14  ;;  %v185_v22 = vmul.f32 %v184_v11, %v79_v14  ;;  %v205_v23 = vmul.f32 %v204_v12, %v79_v14 }
  0x47   :  { %v83_v24 = vadd.f32 %v82_v15, %v71_v13  ;;  %v90_v25 = vadd.f32 %v89_v16, %v71_v13  ;;  %v106_v26 = vadd.f32 %v105_v17, %v71_v13  ;;  %v126_v27 = vadd.f32 %v125_v18, %v71_v13 }
  0x48   :  { %v146_v28 = vadd.f32 %v145_v20, %v71_v13  ;;  %v166_v29 = vadd.f32 %v165_v21, %v71_v13  ;;  %v186_v30 = vadd.f32 %v185_v22, %v71_v13  ;;  %v206_v31 = vadd.f32 %v205_v23, %v71_v13 }
  0x49   :  { %v85_v32 = vsub.f32 %v562_v19, %v83_v24  ;;  %v93_v33 = vsub.f32 %v562_v19, %v90_v25  ;;  %v109_v34 = vsub.f32 %v562_v19, %v106_v26  ;;  %84 = vst [vmem:[#allocation10] sm:$0xff] %v83_v24  ;;  %92 = vst [vmem:[#allocation10 + $0x8] sm:$0xff] %v90_v25 }
  0x4a   :  { %108 = vst [vmem:[#allocation10 + $0x10] sm:$0xff] %v106_v26  ;;  %128 = vst [vmem:[#allocation10 + $0x18] sm:$0xff] %v126_v27  ;;  %v129_v35 = vsub.f32 %v562_v19, %v126_v27  ;;  %v149_v41 = vsub.f32 %v562_v19, %v146_v28  ;;  %v225_v45 = vmul.f32 %v224_v36, %v79_v14 }
  0x4b   :  { %148 = vst [vmem:[#allocation10 + $0x20] sm:$0xff] %v146_v28  ;;  %168 = vst [vmem:[#allocation10 + $0x28] sm:$0xff] %v166_v29  ;;  %v86_v37 = vmul.f32 %v85_v32, %v85_v32  ;;  %v94_v38 = vmul.f32 %v93_v33, %v93_v33  ;;  %v568_v39 = vmul.f32 %v109_v34, %v109_v34 }
  0x4c   :  { %188 = vst [vmem:[#allocation10 + $0x30] sm:$0xff] %v186_v30  ;;  %208 = vst [vmem:[#allocation10 + $0x38] sm:$0xff] %v206_v31  ;;  %v573_v46 = vmul.f32 %v129_v35, %v129_v35  ;;  %v169_v47 = vsub.f32 %v562_v19, %v166_v29  ;;  %v245_v48 = vmul.f32 %v244_v40, %v79_v14 }
  0x4d   :  { %v95_v42 = vadd.f32 %v94_v38, %v86_v37  ;;  %v96_v43 = vsub.f32 %v94_v38, %v86_v37  ;;  %v571_v44 = vmin.f32 %v86_v37, %v94_v38  ;;  %v189_v52 = vsub.f32 %v562_v19, %v186_v30 }
  0x4e   :  { %v584_v54 = vmul.f32 %v149_v41, %v149_v41  ;;  %v226_v55 = vadd.f32 %v225_v45, %v71_v13  ;;  %v246_v56 = vadd.f32 %v245_v48, %v71_v13  ;;  %v593_v62 = vmul.f32 %v169_v47, %v169_v47 }
  0x4f   :  { %v97_v49 = vand.u32 2147483647, %v96_v43  ;;  %v111_v50 = vadd.f32 %v568_v39, %v95_v42  ;;  %v112_v51 = vsub.f32 %v568_v39, %v571_v44  ;;  %v582_v53 = vmin.f32 %v571_v44, %v568_v39 }
  0x50   :  { %v209_v63 = vsub.f32 %v562_v19, %v206_v31  ;;  %228 = vst [vmem:[#allocation10 + $0x40] sm:$0xff] %v226_v55  ;;  %248 = vst [vmem:[#allocation10 + $0x48] sm:$0xff] %v246_v56 }
  0x51   :  { %v98_v57 = vmul.f32 -2.0, %v97_v49  ;;  %v113_v58 = vand.u32 2147483647, %v112_v51  ;;  %v131_v59 = vadd.f32 %v573_v46, %v111_v50  ;;  %v132_v60 = vsub.f32 %v573_v46, %v582_v53 }
  0x52   :  { %v591_v61 = vmin.f32 %v582_v53, %v573_v46 }
  0x53   :  { %v99_v0 = vmul.f32 1.442695, %v98_v57  ;;  %v114_v1 = vmul.f32 -2.0, %v113_v58  ;;  %v151_v2 = vadd.f32 %v584_v54, %v131_v59 }
  0x54   :  { %444 = shalt.err (!%p441_p10)
}
  0x55   :  { %284 = dma.vmem_to_hbm [thread:$0]  %s279_s3, 1280, %s678_s4, [#allocation4], %s507_s0, %s507_s0, %s508_s14   ;;  %v133_v3 = vand.u32 2147483647, %v132_v60  ;;  %v152_v4 = vsub.f32 %v584_v54, %v591_v61  ;;  %v607_v5 = vmin.f32 %v591_v61, %v584_v54  ;;  %v609_v6 = vmul.f32 %v189_v52, %v189_v52 }
  0x56   :  { %333 = vpow2.f32 %v99_v0  ;;  %v115_v7 = vmul.f32 1.442695, %v114_v1  ;;  %v171_v8 = vadd.f32 %v593_v62, %v151_v2  ;;  %v229_v9 = vsub.f32 %v562_v19, %v226_v55  ;;  %s510_s4 = smov [#allocation11]  }
  0x57   :  { %v134_v10 = vmul.f32 -2.0, %v133_v3  ;;  %v153_v11 = vand.u32 2147483647, %v152_v4  ;;  %v172_v12 = vsub.f32 %v593_v62, %v607_v5  ;;  %v615_v13 = vmul.f32 %v209_v63, %v209_v63  ;;  %s291_s20 = sshll.u32 %s510_s4, 4  ;;  %s292_s20 = int_to_ptr.vmem [resolvable:$true] %s291_s20 }
  0x58   :  { %335 = vpow2.f32 %v115_v7  ;;  %v191_v14 = vadd.f32 %v609_v6, %v171_v8  ;;  %v249_v15 = vsub.f32 %v562_v19, %v246_v56  ;;  %v621_v16 = vmin.f32 %v607_v5, %v593_v62  ;;  %s453_s21 = scalar_lea.vmem %s292_s20, 128  ;;  %p458_p12 = scmp.lt.s32.totalorder %s292_s20, %s292_s20 }
  0x59   :  { %v135_v17 = vmul.f32 1.442695, %v134_v10  ;;  %v154_v18 = vmul.f32 -2.0, %v153_v11  ;;  %v173_v20 = vand.u32 2147483647, %v172_v12  ;;  %v624_v22 = vmul.f32 %v229_v9, %v229_v9  ;;  %p454_p11 = scmp.ne.s32.totalorder %s292_s20, %s453_s21  ;;  %p459_p13 = scmp.lt.s32.totalorder %s453_s21, %s453_s21 }
  0x5a   :  { %v211_v21 = vadd.f32 %v615_v13, %v191_v14  ;;  %v192_v23 = vsub.f32 %v609_v6, %v621_v16  ;;  %v630_v24 = vmin.f32 %v621_v16, %v609_v6  ;;  %v633_v26 = vmul.f32 %v249_v15, %v249_v15 }
  0x5b   :  { %337 = vpow2.f32 %v135_v17  ;;  %v155_v19 = vmul.f32 1.442695, %v154_v18  ;;  %v174_v27 = vmul.f32 -2.0, %v173_v20  ;;  %p460_p0 = por %p459_p13, %p458_p12 }
  0x5c   :  { %v231_v25 = vadd.f32 %v624_v22, %v211_v21  ;;  %v193_v29 = vand.u32 2147483647, %v192_v23  ;;  %v212_v30 = vsub.f32 %v615_v13, %v630_v24  ;;  %v640_v32 = vmin.f32 %v630_v24, %v615_v13 }
  0x5d   :  { %339 = vpow2.f32 %v155_v19  ;;  %v175_v33 = vmul.f32 1.442695, %v174_v27  ;;  %p461_p1 = pnand %p460_p0, %p454_p11 }
  0x5e   :  { %v251_v28 = vadd.f32 %v633_v26, %v231_v25  ;;  %v194_v35 = vmul.f32 -2.0, %v193_v29  ;;  %v213_v37 = vand.u32 2147483647, %v212_v30  ;;  %v232_v40 = vsub.f32 %v624_v22, %v640_v32 }
  0x5f   :  { %341 = vpow2.f32 %v175_v33  ;;  %v646_v42 = vmin.f32 %v640_v32, %v624_v22 }
  0x60   :  { %v263_v31 = vmul.f32 -0.2, %v251_v28  ;;  %v195_v47 = vmul.f32 1.442695, %v194_v35 }
  0x62   :  { %v319_v34 = vadd.f32 -0.22579135, %v263_v31 }
  0x63   :  { %v334_v36 = vpop.eup %333 }
  0x64   :  { %v101_v38 = vadd.f32 1.0, %v334_v36  ;;  %265 = vst [vmem:[#allocation11] sm:$0xff] %v319_v34 }
  0x65   :  { %v336_v41 = vpop.eup %335 }
  0x66   :  { %v118_v43 = vadd.f32 %v336_v41, %v101_v38  ;;  %v119_v45 = vmul.f32 %v336_v41, %v101_v38 }
  0x67   :  { %464 = shalt.err (!%p461_p1)
}
  0x68   :  { %294 = dma.vmem_to_hbm [thread:$0]  %s292_s20, 128, %s679_s5, [#allocation12]   ;;  %vm117_vm2 = vcmp.ge.f32.partialorder %v568_v39, %v571_v44  ;;  %v214_v48 = vmul.f32 -2.0, %v213_v37  ;;  %v338_v49 = vpop.eup %337  ;;  %v120_v50 = vadd.f32 1.0, %v119_v45  ;;  %v233_v51 = vand.u32 2147483647, %v232_v40 }
  0x69   :  { %v252_v52 = vsub.f32 %v633_v26, %v646_v42  ;;  %343 = vpow2.f32 %v195_v47  ;;  %vm137_vm3 = vcmp.ge.f32.partialorder %v573_v46, %v582_v53  ;;  %vm157_vm4 = vcmp.ge.f32.partialorder %v584_v54, %v591_v61  ;;  %s511_s5 = smov [#allocation13]  }
  0x6a   :  { %v121_v55 = vsel %vm117_vm2, %v118_v43, %v120_v50  ;;  %v215_v58 = vmul.f32 1.442695, %v214_v48  ;;  %v234_v59 = vmul.f32 -2.0, %v233_v51  ;;  %v340_v60 = vpop.eup %339  ;;  %vm177_vm5 = vcmp.ge.f32.partialorder %v593_v62, %v607_v5  ;;  %s301_s24 = sshll.u32 %s511_s5, 4  ;;  %s302_s24 = int_to_ptr.vmem [resolvable:$true] %s301_s24 }
  0x6b   :  { %v138_v56 = vadd.f32 %v338_v49, %v121_v55  ;;  %v139_v57 = vmul.f32 %v338_v49, %v121_v55  ;;  %v253_v0 = vand.u32 2147483647, %v252_v52  ;;  %vm197_vm6 = vcmp.ge.f32.partialorder %v609_v6, %v621_v16  ;;  %s473_s25 = scalar_lea.vmem %s302_s24, 128  ;;  %p478_p3 = scmp.lt.s32.totalorder %s302_s24, %s302_s24 }
  0x6c   :  { %345 = vpow2.f32 %v215_v58  ;;  %v235_v2 = vmul.f32 1.442695, %v234_v59  ;;  %v342_v4 = vpop.eup %341  ;;  %vm217_vm7 = vcmp.ge.f32.partialorder %v615_v13, %v630_v24  ;;  %vm237_vm8 = vcmp.ge.f32.partialorder %v624_v22, %v640_v32  ;;  %p474_p2 = scmp.ne.s32.totalorder %s302_s24, %s473_s25  ;;  %p479_p4 = scmp.lt.s32.totalorder %s473_s25, %s473_s25 }
  0x6d   :  { %v140_v63 = vadd.f32 1.0, %v139_v57  ;;  %v254_v3 = vmul.f32 -2.0, %v253_v0  ;;  %vm257_vm9 = vcmp.ge.f32.partialorder %v633_v26, %v646_v42  ;;  %v262_v13 = vmin.f32 %v646_v42, %v633_v26 }
  0x6e   :  { %347 = vpow2.f32 %v235_v2  ;;  %p480_p5 = por %p479_p4, %p478_p3 }
  0x6f   :  { %v141_v39 = vsel %vm137_vm3, %v138_v56, %v140_v63  ;;  %v255_v46 = vmul.f32 1.442695, %v254_v3  ;;  %v266_v24 = vmul.f32 -2.0, %v262_v13 }
  0x70   :  { %v158_v44 = vadd.f32 %v340_v60, %v141_v39  ;;  %v159_v1 = vmul.f32 %v340_v60, %v141_v39  ;;  %p481_p6 = pnand %p480_p5, %p474_p2 }
  0x71   :  { %349 = vpow2.f32 %v255_v46  ;;  %v320_v31 = vadd.f32 -0.22579135, %v266_v24 }
  0x72   :  { %v160_v7 = vadd.f32 1.0, %v159_v1 }
  0x74   :  { %v161_v8 = vsel %vm157_vm4, %v158_v44, %v160_v7 }
  0x75   :  { %v178_v9 = vadd.f32 %v342_v4, %v161_v8  ;;  %v179_v10 = vmul.f32 %v342_v4, %v161_v8 }
  0x76   :  { %v344_v53 = vpop.eup %343 }
  0x77   :  { %v180_v11 = vadd.f32 1.0, %v179_v10 }
  0x79   :  { %v181_v12 = vsel %vm177_vm5, %v178_v9, %v180_v11  ;;  %v346_v54 = vpop.eup %345 }
  0x7a   :  { %v198_v14 = vadd.f32 %v344_v53, %v181_v12  ;;  %v199_v15 = vmul.f32 %v344_v53, %v181_v12 }
  0x7b   :  { %v348_v21 = vpop.eup %347 }
  0x7c   :  { %v200_v61 = vadd.f32 1.0, %v199_v15 }
  0x7e   :  { %v201_v17 = vsel %vm197_vm6, %v198_v14, %v200_v61  ;;  %v350_v25 = vpop.eup %349 }
  0x7f   :  { %v218_v18 = vadd.f32 %v346_v54, %v201_v17  ;;  %v219_v20 = vmul.f32 %v346_v54, %v201_v17 }
  0x81   :  { %v220_v23 = vadd.f32 1.0, %v219_v20 }
  0x83   :  { %v221_v62 = vsel %vm217_vm7, %v218_v18, %v220_v23 }
  0x84   :  { %v238_v5 = vadd.f32 %v348_v21, %v221_v62  ;;  %v239_v19 = vmul.f32 %v348_v21, %v221_v62 }
  0x86   :  { %v240_v27 = vadd.f32 1.0, %v239_v19 }
  0x88   :  { %v241_v28 = vsel %vm237_vm8, %v238_v5, %v240_v27 }
  0x89   :  { %v258_v6 = vadd.f32 %v350_v25, %v241_v28  ;;  %v259_v16 = vmul.f32 %v350_v25, %v241_v28 }
  0x8b   :  { %v260_v29 = vadd.f32 1.0, %v259_v16 }
  0x8d   :  { %v261_v30 = vsel %vm257_vm9, %v258_v6, %v260_v29 }
  0x8e   :  { %351 = vlog2.f32 %v261_v30 }
  0x9b   :  { %v352_v33 = vpop.eup %351 }
  0x9c   :  { %v269_v34 = vmul.f32 0.6931472, %v352_v33 }
  0x9e   :  { %v270_v22 = vadd.f32 %v320_v31, %v269_v34 }
  0xa0   :  { %v321_v32 = vadd.f32 -2.3025851, %v270_v22 }
  0xa2   :  { %272 = vst [vmem:[#allocation13] sm:$0xff] %v321_v32 }
  0xa3   :  { %484 = shalt.err (!%p481_p6)
}
  0xa4   :  { %304 = dma.vmem_to_hbm [thread:$0]  %s302_s24, 128, %s680_s6, [#allocation12]  }
  0xa5   :  { %499 = dma.done.wait [#allocation4], 1280  }
  0xa6   :  { %500 = vsyncadd [#allocation4], 4294966016 }
  0xa7   :  { %501 = dma.done.wait [#allocation12], 256  }
  0xa8   :  { %502 = vsyncadd [#allocation12], 4294967040 }
  0xa9   :  { %314 = vsyncpa [#allocation3], 1 }
  0xaa   :  { %315 = vsyncpa [#allocation6], 1 }
  0xab   :  { %316 = vsyncpa [#allocation9], 1 }
  0xac   :  { %317 = vsyncpa [#allocation4], 1 }
  0xad   :  { %318 = vsyncpa [#allocation12], 1 }

</bundles_post_ra>
